<compile_context>
chip_gen: v5e
topology: v5e:2x2
jax: 0.10.0
libtpu: 0.0.40
codegen_flags: <defaults>
</compile_context>

<pallas_src>
import functools

import jax
import jax.numpy as jnp
from jax.experimental import pallas as pl
from jax.experimental.pallas import tpu as pltpu


# ----------------------------------------------------------------------------
# Kernel
# ----------------------------------------------------------------------------
def _block_kernel(add_residual,
                  x_ref,
                  w1_ref, b1_ref,
                  w2_ref, b2_ref,
                  w3_ref, b3_ref,
                  o_ref):
    """Fused (1x1 conv -> BN -> ReLU6) x2 -> 1x1 conv -> BN [-> +x]."""
    x = x_ref[...]                        # (TM, C_in) f32 activation tile

    # conv1 (BN scale folded into w1) + bias + ReLU6
    h = jnp.dot(x.astype(w1_ref.dtype), w1_ref[...],
                preferred_element_type=jnp.float32)
    h = jnp.clip(h + b1_ref[...], 0.0, 6.0)

    # conv2 + bias + ReLU6
    h = jnp.dot(h.astype(w2_ref.dtype), w2_ref[...],
                preferred_element_type=jnp.float32)
    h = jnp.clip(h + b2_ref[...], 0.0, 6.0)

    # conv3 + bias
    y = jnp.dot(h.astype(w3_ref.dtype), w3_ref[...],
                preferred_element_type=jnp.float32)
    y = y + b3_ref[...]

    if add_residual:                      # C_out == C_in, stride == 1 here
        y = y + x.astype(jnp.float32)

    # NOTE: for tiny C_out (< 128 lanes) this store is a masked vst; we do not
    # pad C_out to 128 because that would multiply HBM write bytes.
    o_ref[...] = y.astype(o_ref.dtype)


# ----------------------------------------------------------------------------
# Parameter folding helpers
# ----------------------------------------------------------------------------
def _fold_bn(gamma, beta, mean, var, eps=1e-5):
    # Inference-mode BatchNorm folded into per-channel scale / bias.
    scale = gamma / jnp.sqrt(var + eps)
    bias = beta - mean * scale
    return scale[None, :].astype(jnp.float32), bias[None, :].astype(jnp.float32)


def _fold_scales_into_weights(params, compute_dtype):
    """Fold the per-output-channel BN scales into the conv weights."""
    w1, s1, b1, w2, s2, b2, w3, s3, b3 = params
    # Exact: (x @ w) * s + b == x @ (w * s) + b (s broadcasts on out channels).
    w1f = (w1.astype(jnp.float32) * s1).astype(compute_dtype)
    w2f = (w2.astype(jnp.float32) * s2).astype(compute_dtype)
    w3f = (w3.astype(jnp.float32) * s3).astype(compute_dtype)
    return (w1f, b1.astype(jnp.float32),
            w2f, b2.astype(jnp.float32),
            w3f, b3.astype(jnp.float32))


# ----------------------------------------------------------------------------
# Tile selection (VMEM-budget aware, generation-safe)
# ----------------------------------------------------------------------------
def _pick_tm(rows, c_in, c_mid, c_out, vmem_budget_bytes=24 << 20):
    """Largest row tile whose working set fits a conservative VMEM budget.

    Budget is kept under ~24 MiB so the same choice is safe on v7x (64 MiB
    physical, 32 MiB scoped default) as well as v5e/v6e.  Prefers a tile that
    divides `rows` exactly (no padding pass) and leaves >= 2 grid steps so the
    two TensorCores on v7x both get work.
    """
    def fits(tm):
        blocks = 2 * tm * (c_in + c_out) * 4          # double-buffered in/out
        inter = 2 * tm * c_mid * 4                    # f32 intermediates
        weights = (c_in * c_mid + c_mid * c_mid + c_mid * c_out) * 4
        biases = (2 * c_mid + c_out) * 4
        return blocks + inter + weights + biases <= vmem_budget_bytes

    if rows <= 256:
        return rows                                   # one full-extent block

    cands = [t for t in (2048, 1024, 512, 256, 128) if t <= rows and fits(t)]
    if not cands:
        cands = [128]
    for t in cands:                                   # no pad, >=2 grid steps
        if rows % t == 0 and rows // t >= 2:
            return t
    for t in cands:                                   # no pad
        if rows % t == 0:
            return t
    return cands[0]                                   # fall back to padding


# ----------------------------------------------------------------------------
# Wrappers
# ----------------------------------------------------------------------------
def block_forward_rows(xf, params, *, add_residual,
                       compute_dtype=jnp.float32, tm=None):
    """Block forward on a flattened (rows, C_in) activation matrix.

    Use this directly (keeping activations in NHWC/(rows, C) form) when
    chaining multiple Blocks to avoid per-block NCHW<->NHWC transposes.
    `compute_dtype=jnp.bfloat16` runs the matmuls at native MXU rate with
    f32 accumulation (perf knob; default f32 matches PyTorch exactly).
    """
    rows, c_in = xf.shape
    w1, b1, w2, b2, w3, b3 = _fold_scales_into_weights(params, compute_dtype)
    c_mid = w1.shape[1]
    c_out = w3.shape[1]

    if tm is None:
        tm = _pick_tm(rows, c_in, c_mid, c_out)

    pad = (-rows) % tm
    if pad:  # fallback only; _pick_tm prefers divisors of rows
        xf = jnp.pad(xf, ((0, pad), (0, 0)))
    rows_p = rows + pad
    grid = rows_p // tm

    w_itemsize = jnp.dtype(compute_dtype).itemsize
    w_bytes = (c_in * c_mid + c_mid * c_mid + c_mid * c_out) * w_itemsize
    b_bytes = (2 * c_mid + c_out) * 4
    flops = 2 * rows_p * (c_in * c_mid + c_mid * c_mid + c_mid * c_out)
    bytes_accessed = 4 * rows_p * (c_in + c_out) + w_bytes + b_bytes

    vmem_need = (2 * tm * (c_in + c_out) * 4 + 2 * tm * c_mid * 4
                 + w_bytes + b_bytes)
    vmem_limit = int(min(max(2 * vmem_need, 32 << 20), 48 << 20))

    kernel = functools.partial(_block_kernel, add_residual)
    full = lambda shape: pl.BlockSpec(shape, lambda m: (0, 0))

    out_flat = pl.pallas_call(
        kernel,
        out_shape=jax.ShapeDtypeStruct((rows_p, c_out), jnp.float32),
        grid_spec=pltpu.PrefetchScalarGridSpec(
            num_scalar_prefetch=0,
            grid=(grid,),
            in_specs=[
                pl.BlockSpec((tm, c_in), lambda m: (m, 0)),
                full((c_in, c_mid)), full((1, c_mid)),
                full((c_mid, c_mid)), full((1, c_mid)),
                full((c_mid, c_out)), full((1, c_out)),
            ],
            out_specs=pl.BlockSpec((tm, c_out), lambda m: (m, 0)),
        ),
        compiler_params=pltpu.CompilerParams(
            dimension_semantics=("parallel",),
            vmem_limit_bytes=vmem_limit),
        cost_estimate=pl.CostEstimate(
            flops=int(flops), transcendentals=0,
            bytes_accessed=int(bytes_accessed)),
    )(xf, w1, b1, w2, b2, w3, b3)

    if pad:
        out_flat = out_flat[:rows]
    return out_flat


def block_forward(x_nchw, params, *, i, n, s,
                  compute_dtype=jnp.float32, tm=None):
    """Forward pass of Block for an NCHW float32 input (PyTorch layout)."""
    is_last = (i == n - 1)
    stride = s if is_last else 1

    x = x_nchw
    if stride > 1:
        # Two strided 1x1 convs in the chain; a strided 1x1 conv is a pure
        # spatial subsample, so subsample twice up front.
        x = x[:, :, ::stride, ::stride]
        x = x[:, :, ::stride, ::stride]

    N, C_in, H, W = x.shape
    # TODO(synk): when stacking Blocks into a full MobileNetV2, keep the
    # activations in (rows, C) form and call block_forward_rows directly; the
    # two transposes below are one extra HBM pass each on a mem-bound kernel.
    xf = jnp.transpose(x, (0, 2, 3, 1)).reshape(N * H * W, C_in)

    out_flat = block_forward_rows(xf, params, add_residual=not is_last,
                                  compute_dtype=compute_dtype, tm=tm)

    C_out = out_flat.shape[1]
    out = out_flat.reshape(N, H, W, C_out)
    return jnp.transpose(out, (0, 3, 1, 2))


# ----------------------------------------------------------------------------
# Test scaffolding
# ----------------------------------------------------------------------------
def make_params(key, p_c, i, t, c, n):
    """Deterministic synthetic parameters matching Block.__init__ shapes."""
    _c = c if i == n - 1 else p_c
    _p_c = p_c * t
    k = jax.random.split(key, 3)

    def conv_w(kk, cin, cout):
        # PyTorch conv weight is (cout, cin, 1, 1); store as (cin, cout).
        return jax.random.normal(kk, (cin, cout), jnp.float32) * 0.1

    def bn(cc, offs):
        ar = jnp.arange(cc, dtype=jnp.float32)
        gamma = 1.0 + 0.05 * ar
        beta = 0.01 * (ar + offs)
        mean = 0.02 * ar
        var = 1.0 + 0.1 * ar
        return _fold_bn(gamma, beta, mean, var)

    w1 = conv_w(k[0], p_c, _p_c)
    s1, b1 = bn(_p_c, 0.0)
    w2 = conv_w(k[1], _p_c, _p_c)
    s2, b2 = bn(_p_c, 1.0)
    w3 = conv_w(k[2], _p_c, _c)
    s3, b3 = bn(_c, 2.0)
    return (w1, s1, b1, w2, s2, b2, w3, s3, b3)


def reference_forward(x_nchw, params, *, i, n, s):
    """Pure-JAX reference (same math as the PyTorch module in eval mode)."""
    is_last = (i == n - 1)
    stride = s if is_last else 1
    x = x_nchw
    if stride > 1:
        x = x[:, :, ::stride, ::stride]
        x = x[:, :, ::stride, ::stride]
    N, C, H, W = x.shape
    xf = jnp.transpose(x, (0, 2, 3, 1)).reshape(-1, C)
    w1, s1, b1, w2, s2, b2, w3, s3, b3 = params
    h = jnp.clip(xf @ w1 * s1 + b1, 0.0, 6.0)
    h = jnp.clip(h @ w2 * s2 + b2, 0.0, 6.0)
    y = h @ w3 * s3 + b3
    if not is_last:
        y = y + xf
    y = y.reshape(N, H, W, -1)
    return jnp.transpose(y, (0, 3, 1, 2))


if __name__ == "__main__":
    # Block(p_c=4, i=0, t=6, c=8, n=2, s=2) -> residual branch (i != n-1),
    # so stride = 1 and output channels = p_c = 4.
    p_c, i, t, c, n, s = 4, 0, 6, 8, 2, 2
    key = jax.random.PRNGKey(0)
    kx, kp = jax.random.split(key)

    x = jax.random.normal(kx, (2, p_c, 16, 16), jnp.float32)  # NCHW like PyTorch
    params = make_params(kp, p_c, i, t, c, n)

    out = block_forward(x, params, i=i, n=n, s=s)
    out = jax.block_until_ready(out)

    ref = reference_forward(x, params, i=i, n=n, s=s)
    assert out.shape == x.shape, (out.shape, x.shape)
    assert jnp.allclose(out, ref, atol=1e-5, rtol=1e-5), "mismatch vs reference"

    # TODO(synk): BatchNorm is implemented in inference mode (folded running
    # stats); PyTorch training-mode batch statistics are not reproduced.
    print("KERNEL_OK")
</pallas_src>

<mosaic_0001>
module attributes {stable_mosaic.version = 11 : i64} {
  func.func @_block_kernel(%arg0: i32, %arg1: memref<256x4xf32, #tpu.memory_space<vmem>>, %arg2: memref<4x24xf32, #tpu.memory_space<vmem>>, %arg3: memref<1x24xf32, #tpu.memory_space<vmem>>, %arg4: memref<24x24xf32, #tpu.memory_space<vmem>>, %arg5: memref<1x24xf32, #tpu.memory_space<vmem>>, %arg6: memref<24x4xf32, #tpu.memory_space<vmem>>, %arg7: memref<1x4xf32, #tpu.memory_space<vmem>>, %arg8: memref<256x4xf32, #tpu.memory_space<vmem>>) attributes {dimension_semantics = [#tpu.dimension_semantics<parallel>], iteration_bounds = array<i64: 2>, scalar_prefetch = 0 : i64, scratch_operands = 0 : i64, tpu.core_type = #tpu.core_type<tc>, window_params = [{transform_indices = @transform_0, window_bounds = array<i64: 256, 4>}, {pipeline_mode = #tpu.pipeline_mode<synchronous>, transform_indices = @transform_1, window_bounds = array<i64: 4, 24>}, {pipeline_mode = #tpu.pipeline_mode<synchronous>, transform_indices = @transform_2, window_bounds = array<i64: 1, 24>}, {pipeline_mode = #tpu.pipeline_mode<synchronous>, transform_indices = @transform_3, window_bounds = array<i64: 24, 24>}, {pipeline_mode = #tpu.pipeline_mode<synchronous>, transform_indices = @transform_4, window_bounds = array<i64: 1, 24>}, {pipeline_mode = #tpu.pipeline_mode<synchronous>, transform_indices = @transform_5, window_bounds = array<i64: 24, 4>}, {pipeline_mode = #tpu.pipeline_mode<synchronous>, transform_indices = @transform_6, window_bounds = array<i64: 1, 4>}, {transform_indices = @transform_7, window_bounds = array<i64: 256, 4>}]} {
    %c0 = arith.constant 0 : index
    %c0_0 = arith.constant 0 : index
    %0 = vector.load %arg1[%c0, %c0_0] : memref<256x4xf32, #tpu.memory_space<vmem>>, vector<256x4xf32>
    %c0_1 = arith.constant 0 : index
    %c0_2 = arith.constant 0 : index
    %1 = vector.load %arg2[%c0_1, %c0_2] : memref<4x24xf32, #tpu.memory_space<vmem>>, vector<4x24xf32>
    %cst = arith.constant dense<0.000000e+00> : vector<256x24xf32>
    %2 = tpu.matmul %0, %1, %cst {dimension_numbers = #tpu.dot_dimension_numbers<[1], [0], [0], [1], [0, 0, 1, 1], [], []>} : vector<256x4xf32>, vector<4x24xf32>, vector<256x24xf32> -> vector<256x24xf32>
    %c0_3 = arith.constant 0 : index
    %c0_4 = arith.constant 0 : index
    %3 = vector.load %arg3[%c0_3, %c0_4] : memref<1x24xf32, #tpu.memory_space<vmem>>, vector<1x24xf32>
    %4 = vector.broadcast %3 : vector<1x24xf32> to vector<256x24xf32>
    %5 = arith.addf %2, %4 : vector<256x24xf32>
    %cst_5 = arith.constant 0.000000e+00 : f32
    %cst_6 = arith.constant 6.000000e+00 : f32
    %6 = vector.broadcast %cst_5 : f32 to vector<256x24xf32>
    %7 = arith.maximumf %6, %5 : vector<256x24xf32>
    %8 = vector.broadcast %cst_6 : f32 to vector<256x24xf32>
    %9 = arith.minimumf %8, %7 : vector<256x24xf32>
    %c0_7 = arith.constant 0 : index
    %c0_8 = arith.constant 0 : index
    %10 = vector.load %arg4[%c0_7, %c0_8] : memref<24x24xf32, #tpu.memory_space<vmem>>, vector<24x24xf32>
    %cst_9 = arith.constant dense<0.000000e+00> : vector<256x24xf32>
    %11 = tpu.matmul %9, %10, %cst_9 {dimension_numbers = #tpu.dot_dimension_numbers<[1], [0], [0], [1], [0, 0, 1, 1], [], []>} : vector<256x24xf32>, vector<24x24xf32>, vector<256x24xf32> -> vector<256x24xf32>
    %c0_10 = arith.constant 0 : index
    %c0_11 = arith.constant 0 : index
    %12 = vector.load %arg5[%c0_10, %c0_11] : memref<1x24xf32, #tpu.memory_space<vmem>>, vector<1x24xf32>
    %13 = vector.broadcast %12 : vector<1x24xf32> to vector<256x24xf32>
    %14 = arith.addf %11, %13 : vector<256x24xf32>
    %cst_12 = arith.constant 0.000000e+00 : f32
    %cst_13 = arith.constant 6.000000e+00 : f32
    %15 = vector.broadcast %cst_12 : f32 to vector<256x24xf32>
    %16 = arith.maximumf %15, %14 : vector<256x24xf32>
    %17 = vector.broadcast %cst_13 : f32 to vector<256x24xf32>
    %18 = arith.minimumf %17, %16 : vector<256x24xf32>
    %c0_14 = arith.constant 0 : index
    %c0_15 = arith.constant 0 : index
    %19 = vector.load %arg6[%c0_14, %c0_15] : memref<24x4xf32, #tpu.memory_space<vmem>>, vector<24x4xf32>
    %cst_16 = arith.constant dense<0.000000e+00> : vector<256x4xf32>
    %20 = tpu.matmul %18, %19, %cst_16 {dimension_numbers = #tpu.dot_dimension_numbers<[1], [0], [0], [1], [0, 0, 1, 1], [], []>} : vector<256x24xf32>, vector<24x4xf32>, vector<256x4xf32> -> vector<256x4xf32>
    %c0_17 = arith.constant 0 : index
    %c0_18 = arith.constant 0 : index
    %21 = vector.load %arg7[%c0_17, %c0_18] : memref<1x4xf32, #tpu.memory_space<vmem>>, vector<1x4xf32>
    %22 = vector.broadcast %21 : vector<1x4xf32> to vector<256x4xf32>
    %23 = arith.addf %20, %22 : vector<256x4xf32>
    %24 = arith.addf %23, %0 : vector<256x4xf32>
    %c0_19 = arith.constant 0 : index
    %c0_20 = arith.constant 0 : index
    %25 = vector.load %arg8[%c0_19, %c0_20] : memref<256x4xf32, #tpu.memory_space<vmem>>, vector<256x4xf32>
    tpu.vector_store %arg8[%c0_19, %c0_20], %24 {strides = array<i32>} : memref<256x4xf32, #tpu.memory_space<vmem>>, vector<256x4xf32>,
    return
  }
  func.func @transform_0(%arg0: i32) -> (i32, i32) {
    %c0_i32 = arith.constant 0 : i32
    %c0_i32_0 = arith.constant 0 : i32
    return %arg0, %c0_i32 : i32, i32
  }
  func.func @transform_1(%arg0: i32) -> (i32, i32) {
    %c0_i32 = arith.constant 0 : i32
    %c0_i32_0 = arith.constant 0 : i32
    %c0_i32_1 = arith.constant 0 : i32
    return %c0_i32, %c0_i32_0 : i32, i32
  }
  func.func @transform_2(%arg0: i32) -> (i32, i32) {
    %c0_i32 = arith.constant 0 : i32
    %c0_i32_0 = arith.constant 0 : i32
    %c0_i32_1 = arith.constant 0 : i32
    return %c0_i32, %c0_i32_0 : i32, i32
  }
  func.func @transform_3(%arg0: i32) -> (i32, i32) {
    %c0_i32 = arith.constant 0 : i32
    %c0_i32_0 = arith.constant 0 : i32
    %c0_i32_1 = arith.constant 0 : i32
    return %c0_i32, %c0_i32_0 : i32, i32
  }
  func.func @transform_4(%arg0: i32) -> (i32, i32) {
    %c0_i32 = arith.constant 0 : i32
    %c0_i32_0 = arith.constant 0 : i32
    %c0_i32_1 = arith.constant 0 : i32
    return %c0_i32, %c0_i32_0 : i32, i32
  }
  func.func @transform_5(%arg0: i32) -> (i32, i32) {
    %c0_i32 = arith.constant 0 : i32
    %c0_i32_0 = arith.constant 0 : i32
    %c0_i32_1 = arith.constant 0 : i32
    return %c0_i32, %c0_i32_0 : i32, i32
  }
  func.func @transform_6(%arg0: i32) -> (i32, i32) {
    %c0_i32 = arith.constant 0 : i32
    %c0_i32_0 = arith.constant 0 : i32
    %c0_i32_1 = arith.constant 0 : i32
    return %c0_i32, %c0_i32_0 : i32, i32
  }
  func.func @transform_7(%arg0: i32) -> (i32, i32) {
    %c0_i32 = arith.constant 0 : i32
    %c0_i32_0 = arith.constant 0 : i32
    return %arg0, %c0_i32 : i32, i32
  }
}

</mosaic_0001>

<bundles_post_ra>
// kernel: tpu_custom_call.1
= control target key start
LH: loop header
LB: loop body
LE: loop exit
PB: predicated region body
PF: predicated region fallthrough
CT: control target
= control target key end

     0   :  { %s1388_s24 = smov 0   ;;  %s1868_s0 = inlined_call_operand.vmem [shape: f32[512,4], index: 0, kind: input, shape index: {}]   ;;  %s1869_s1 = inlined_call_operand.vmem [shape: f32[4,24], index: 1, kind: input, shape index: {}]   ;;  %s1870_s2 = inlined_call_operand.vmem [shape: f32[1,24], index: 2, kind: input, shape index: {}]   ;;  %s1871_s3 = inlined_call_operand.vmem [shape: f32[24,24], index: 3, kind: input, shape index: {}]   ;;  %s1872_s4 = inlined_call_operand.vmem [shape: f32[1,24], index: 4, kind: input, shape index: {}]   ;;  %s1873_s5 = inlined_call_operand.vmem [shape: f32[24,4], index: 5, kind: input, shape index: {}]   ;;  %s1874_s6 = inlined_call_operand.vmem [shape: f32[1,4], index: 6, kind: input, shape index: {}]   ;;  %s1875_s7 = inlined_call_operand.vmem [shape: f32[512,4], index: 7, kind: output, shape index: {}]  }
   0x1 LB: > { %s1214_s25 = sadd.s32 4294967295, %s1346_s24   ;;  %p1218_p0 = scmp.ge.s32.totalorder %s1346_s24, 1  ;;  %s1346_s24 = sphi %s1388_s24, %s17_s24  }
   0x2   : > { %p238_p1 = scmp.lt.s32.totalorder %s1346_s24, 3 }
   0x4   : > { %p239_p2 = pnand %p1218_p0, %p238_p1 }
   0x5   : > { %s1219_s28 = sshll.u32 (!%p239_p2), %s1214_s25, 5 }
   0x6   : > { %242 = sbr.rel (%p239_p2) target bundleno = 670 (0x29e), region = 48  ;;  %p271_p3 = scmp.lt.s32.totalorder (!%p239_p2), %s1219_s28, 63 }
   0xb   : > { %v314_v0 = vld [vmem:[%s1869_s1] sm:$0xf]  ;;  %vm416_vm0 = vcmask 1043456   ;;  %s1877_s28 = smov (!%p271_p3, %s1219_s28), 63  ;;  %vm319_vm1 = vcmask 31744   ;;  %v599_v14 = vld [vmem:[%s1871_s3 + $0x10] sm:$0xff] }
   0xc   : > { %1223 = vmatpush.msk.msra.mxu0 %vm416_vm0, %v314_v0  ;;  %1322 = vmatpush.msk.msra.mxu3 %vm416_vm0, %v314_v0  ;;  %s1220_s29 = sshll.u32 %s1877_s28, 3  ;;  %v598_v15 = vld [vmem:[%s1871_s3 + $0x8] sm:$0xff]  ;;  %v597_v16 = vld [vmem:[%s1871_s3] sm:$0xff]  ;;  %vm604_vm2 = vcmask 195584  }
   0xd   : > { %s1407_s9 = scalar_lea.vmem %s1868_s0, %s1220_s29  ;;  %714 = vmatpush.msra.mxu1 %v599_v14  ;;  %v1501_v20 = vld [vmem:[%s1870_s2] ss:$0 sm:$0xff]  ;;  %s1707_s10 = scalar_lea.vmem %s1875_s7, %s1220_s29 }
   0xe   : > { %v1410_v1 = vld [vmem:[%s1407_s9] sm:$0xff]  ;;  %v1415_v2 = vld [vmem:[%s1407_s9 + $0x8] sm:$0xff]  ;;  %v1420_v3 = vld [vmem:[%s1407_s9 + $0x10] sm:$0xff]  ;;  %1323 = vmatpush.msrb.mxu3 %v599_v14 }
   0xf   : > { %1224 = vmatmul.msk.f32.vlgmr.msra.gmra.mxu0 %vm319_vm1, %v1410_v1  ;;  %v1425_v4 = vld [vmem:[%s1407_s9 + $0x18] sm:$0xff]  ;;  %v1430_v5 = vld [vmem:[%s1407_s9 + $0x20] sm:$0xff]  ;;  %v1435_v6 = vld [vmem:[%s1407_s9 + $0x28] sm:$0xff]  ;;  %715 = vmatpush.msra.mxu1 %v598_v15 }
  0x10   : > { %v1440_v7 = vld [vmem:[%s1407_s9 + $0x30] sm:$0xff]  ;;  %v1445_v8 = vld [vmem:[%s1407_s9 + $0x38] sm:$0xff]  ;;  %v1450_v9 = vld [vmem:[%s1407_s9 + $0x40] sm:$0xff]  ;;  %1324 = vmatpush.msrb.mxu3 %v598_v15 }
  0x11   : > { %v1455_v10 = vld [vmem:[%s1407_s9 + $0x48] sm:$0xff]  ;;  %v1460_v11 = vld [vmem:[%s1407_s9 + $0x50] sm:$0xff]  ;;  %v1465_v12 = vld [vmem:[%s1407_s9 + $0x58] sm:$0xff]  ;;  %716 = vmatpush.msra.mxu1 %v597_v16 }
  0x12   : > { %v1470_v13 = vld [vmem:[%s1407_s9 + $0x60] sm:$0xff]  ;;  %1325 = vmatpush.msrb.mxu3 %v597_v16  ;;  %v1484_v17 = vld [vmem:[%s1407_s9 + $0x68] sm:$0xff]  ;;  %v1489_v18 = vld [vmem:[%s1407_s9 + $0x70] sm:$0xff] }
  0x13   : > { %v1494_v19 = vld [vmem:[%s1407_s9 + $0x78] sm:$0xff]  ;;  %v1504_v22 = vld [vmem:[%s1407_s9 + $0x80] sm:$0xff]  ;;  %v1511_v27 = vld [vmem:[%s1407_s9 + $0x88] sm:$0xff] }
  0x14   : > { %v1518_v32 = vld [vmem:[%s1407_s9 + $0x90] sm:$0xff]  ;;  %v1525_v37 = vld [vmem:[%s1407_s9 + $0x98] sm:$0xff]  ;;  %v1532_v42 = vld [vmem:[%s1407_s9 + $0xa0] sm:$0xff] }
  0x15   : > { %v1538_v45 = vld [vmem:[%s1407_s9 + $0xc8] sm:$0xff]  ;;  %v1550_v51 = vld [vmem:[%s1407_s9 + $0xd0] sm:$0xff]  ;;  %v1562_v57 = vld [vmem:[%s1407_s9 + $0xd8] sm:$0xff] }
  0x16   : > { %1249 = vmatmul.msk.f32.vlgmr.msra.gmra.mxu3 %vm319_vm1, %v1538_v45  ;;  %v1544_v48 = vld [vmem:[%s1407_s9 + $0xa8] sm:$0xff]  ;;  %v1556_v54 = vld [vmem:[%s1407_s9 + $0xb0] sm:$0xff]  ;;  %v1568_v60 = vld [vmem:[%s1407_s9 + $0xb8] sm:$0xff] }
  0x17   : > { %1225 = vmatmul.msk.f32.gmra.mxu0 %vm319_vm1, %v1415_v2  ;;  %v1574_v63 = vld [vmem:[%s1407_s9 + $0xe0] sm:$0xff] }
  0x18   : > { %v1580_v15 = vld [vmem:[%s1407_s9 + $0xc0] sm:$0xff] }
  0x1e   : > { %1250 = vmatmul.msk.f32.gmra.mxu3 %vm319_vm1, %v1550_v51 }
  0x1f   : > { %1226 = vmatmul.msk.f32.gmra.mxu0 %vm319_vm1, %v1420_v3 }
  0x26   : > { %1251 = vmatmul.msk.f32.gmra.mxu3 %vm319_vm1, %v1562_v57 }
  0x27   : > { %1227 = vmatmul.msk.f32.gmra.mxu0 %vm319_vm1, %v1425_v4 }
  0x2e   : > { %1252 = vmatmul.msk.f32.gmra.mxu3 %vm319_vm1, %v1574_v63 }
  0x2f   : > { %1228 = vmatmul.msk.f32.gmra.mxu0 %vm319_vm1, %v1430_v5 }
  0x37   : > { %1229 = vmatmul.msk.f32.gmra.mxu0 %vm319_vm1, %v1435_v6 }
  0x3f   : > { %1230 = vmatmul.msk.f32.gmra.mxu0 %vm319_vm1, %v1440_v7 }
  0x47   : > { %1231 = vmatmul.msk.f32.gmra.mxu0 %vm319_vm1, %v1445_v8 }
  0x4f   : > { %1232 = vmatmul.msk.f32.gmra.mxu0 %vm319_vm1, %v1450_v9 }
  0x57   : > { %1233 = vmatmul.msk.f32.gmra.mxu0 %vm319_vm1, %v1455_v10 }
  0x5f   : > { %1234 = vmatmul.msk.f32.gmra.mxu0 %vm319_vm1, %v1460_v11 }
  0x67   : > { %1235 = vmatmul.msk.f32.gmra.mxu0 %vm319_vm1, %v1465_v12 }
  0x6f   : > { %1236 = vmatmul.msk.f32.gmra.mxu0 %vm319_vm1, %v1470_v13 }
  0x77   : > { %1237 = vmatmul.msk.f32.gmra.mxu0 %vm319_vm1, %v1484_v17 }
  0x7f   : > { %1238 = vmatmul.msk.f32.gmra.mxu0 %vm319_vm1, %v1489_v18 }
  0x87   : > { %1239 = vmatmul.msk.f32.gmra.mxu0 %vm319_vm1, %v1494_v19 }
  0x8c   : > { %v437_v21 = vpop.f32.mrf.mxu0 }
  0x8d   : > { %v438_v23 = vadd.f32 %v1501_v20, %v437_v21 }
  0x8f   : > { %v533_v24 = vmax.f32 %v438_v23, 0.0  ;;  %1240 = vmatmul.msk.f32.gmra.mxu0 %vm319_vm1, %v1504_v22  ;;  %v1586_v23 = vld [vmem:[%s1407_s9 + $0xe8] sm:$0xff] }
  0x90   : > { %1253 = vmatmul.msk.f32.gmra.mxu3 %vm319_vm1, %v1586_v23 }
  0x91   : > { %v565_v25 = vmin.f32 %v533_v24, 6.0 }
  0x93   : > { %1256 = vmatmul.msk.f32.vlgmr.msra.gmra.mxu1 %vm604_vm2, %v565_v25 }
  0x94   : > { %v440_v26 = vpop.f32.mrf.mxu0 }
  0x95   : > { %v441_v28 = vadd.f32 %v1501_v20, %v440_v26 }
  0x97   : > { %v534_v29 = vmax.f32 %v441_v28, 0.0  ;;  %1241 = vmatmul.msk.f32.gmra.mxu0 %vm319_vm1, %v1511_v27 }
  0x99   : > { %v566_v30 = vmin.f32 %v534_v29, 6.0  ;;  %v1593_v29 = vld [vmem:[%s1407_s9 + $0xf0] sm:$0xff] }
  0x9a   : > { %1254 = vmatmul.msk.f32.gmra.mxu3 %vm319_vm1, %v1593_v29 }
  0x9b   : > { %1257 = vmatmul.msk.f32.gmra.mxu1 %vm604_vm2, %v566_v30 }
  0x9c   : > { %v443_v31 = vpop.f32.mrf.mxu0 }
  0x9d   : > { %v444_v33 = vadd.f32 %v1501_v20, %v443_v31 }
  0x9f   : > { %v535_v34 = vmax.f32 %v444_v33, 0.0  ;;  %1242 = vmatmul.msk.f32.gmra.mxu0 %vm319_vm1, %v1518_v32 }
  0xa1   : > { %v567_v35 = vmin.f32 %v535_v34, 6.0 }
  0xa3   : > { %1258 = vmatmul.msk.f32.gmra.mxu1 %vm604_vm2, %v567_v35  ;;  %v1600_v35 = vld [vmem:[%s1407_s9 + $0xf8] sm:$0xff] }
  0xa4   : > { %v446_v36 = vpop.f32.mrf.mxu0  ;;  %1255 = vmatmul.msk.f32.gmra.mxu3 %vm319_vm1, %v1600_v35 }
  0xa5   : > { %v447_v38 = vadd.f32 %v1501_v20, %v446_v36 }
  0xa7   : > { %v536_v39 = vmax.f32 %v447_v38, 0.0  ;;  %1243 = vmatmul.msk.f32.gmra.mxu0 %vm319_vm1, %v1525_v37 }
  0xa9   : > { %v568_v40 = vmin.f32 %v536_v39, 6.0 }
  0xab   : > { %1259 = vmatmul.msk.f32.gmra.mxu1 %vm604_vm2, %v568_v40 }
  0xac   : > { %v449_v41 = vpop.f32.mrf.mxu0 }
  0xad   : > { %v450_v43 = vadd.f32 %v1501_v20, %v449_v41 }
  0xaf   : > { %v537_v44 = vmax.f32 %v450_v43, 0.0  ;;  %1244 = vmatmul.msk.f32.gmra.mxu0 %vm319_vm1, %v1532_v42 }
  0xb1   : > { %v569_v46 = vmin.f32 %v537_v44, 6.0 }
  0xb3   : > { %1260 = vmatmul.msk.f32.gmra.mxu1 %vm604_vm2, %v569_v46 }
  0xb4   : > { %v452_v47 = vpop.f32.mrf.mxu0 }
  0xb5   : > { %v453_v49 = vadd.f32 %v1501_v20, %v452_v47 }
  0xb7   : > { %v538_v50 = vmax.f32 %v453_v49, 0.0  ;;  %1245 = vmatmul.msk.f32.gmra.mxu0 %vm319_vm1, %v1544_v48  ;;  %v880_v49 = vld [vmem:[%s1873_s5 + $0x10] sm:$0xff] }
  0xb8   : > { %994 = vmatpush.msra.mxu2 %v880_v49  ;;  %1326 = vmatpush.msra.mxu3 %v880_v49 }
  0xb9   : > { %v570_v52 = vmin.f32 %v538_v50, 6.0  ;;  %v879_v50 = vld [vmem:[%s1873_s5 + $0x8] sm:$0xff] }
  0xba   : > { %995 = vmatpush.msra.mxu2 %v879_v50  ;;  %1327 = vmatpush.msra.mxu3 %v879_v50 }
  0xbb   : > { %1261 = vmatmul.msk.f32.gmra.mxu1 %vm604_vm2, %v570_v52 }
  0xbc   : > { %v455_v53 = vpop.f32.mrf.mxu0 }
  0xbd   : > { %v456_v55 = vadd.f32 %v1501_v20, %v455_v53 }
  0xbf   : > { %v539_v56 = vmax.f32 %v456_v55, 0.0  ;;  %1246 = vmatmul.msk.f32.gmra.mxu0 %vm319_vm1, %v1556_v54  ;;  %v878_v55 = vld [vmem:[%s1873_s5] sm:$0xff] }
  0xc0   : > { %996 = vmatpush.msra.mxu2 %v878_v55  ;;  %1328 = vmatpush.msra.mxu3 %v878_v55 }
  0xc1   : > { %v571_v58 = vmin.f32 %v539_v56, 6.0 }
  0xc3   : > { %1262 = vmatmul.msk.f32.gmra.mxu1 %vm604_vm2, %v571_v58 }
  0xc4   : > { %v458_v59 = vpop.f32.mrf.mxu0 }
  0xc5   : > { %v459_v61 = vadd.f32 %v1501_v20, %v458_v59 }
  0xc7   : > { %v540_v62 = vmax.f32 %v459_v61, 0.0  ;;  %1247 = vmatmul.msk.f32.gmra.mxu0 %vm319_vm1, %v1568_v60 }
  0xc9   : > { %v572_v0 = vmin.f32 %v540_v62, 6.0 }
  0xcb   : > { %1263 = vmatmul.msk.f32.gmra.mxu1 %vm604_vm2, %v572_v0 }
  0xcc   : > { %v461_v14 = vpop.f32.mrf.mxu0 }
  0xcd   : > { %v462_v16 = vadd.f32 %v1501_v20, %v461_v14 }
  0xcf   : > { %v541_v21 = vmax.f32 %v462_v16, 0.0  ;;  %1248 = vmatmul.msk.f32.gmra.mxu0 %vm319_vm1, %v1580_v15 }
  0xd1   : > { %v573_v24 = vmin.f32 %v541_v21, 6.0 }
  0xd3   : > { %1264 = vmatmul.msk.f32.gmra.mxu1 %vm604_vm2, %v573_v24 }
  0xd4   : > { %v464_v25 = vpop.f32.mrf.mxu0 }
  0xd5   : > { %v465_v26 = vadd.f32 %v1501_v20, %v464_v25 }
  0xd7   : > { %v542_v28 = vmax.f32 %v465_v26, 0.0 }
  0xd9   : > { %v574_v30 = vmin.f32 %v542_v28, 6.0  ;;  %v1628_v28 = vld [vmem:[%s1872_s4] ss:$0 sm:$0xff] }
  0xdb   : > { %1265 = vmatmul.msk.f32.gmra.mxu1 %vm604_vm2, %v574_v30 }
  0xdc   : > { %v467_v31 = vpop.f32.mrf.mxu0 }
  0xdd   : > { %v468_v33 = vadd.f32 %v1501_v20, %v467_v31 }
  0xdf   : > { %v543_v34 = vmax.f32 %v468_v33, 0.0 }
  0xe1   : > { %v575_v36 = vmin.f32 %v543_v34, 6.0 }
  0xe3   : > { %1266 = vmatmul.msk.f32.gmra.mxu1 %vm604_vm2, %v575_v36 }
  0xe4   : > { %v470_v38 = vpop.f32.mrf.mxu0 }
  0xe5   : > { %v471_v39 = vadd.f32 %v1501_v20, %v470_v38 }
  0xe7   : > { %v544_v40 = vmax.f32 %v471_v39, 0.0 }
  0xe9   : > { %v576_v41 = vmin.f32 %v544_v40, 6.0 }
  0xeb   : > { %1267 = vmatmul.msk.f32.gmra.mxu1 %vm604_vm2, %v576_v41 }
  0xec   : > { %v473_v43 = vpop.f32.mrf.mxu0 }
  0xed   : > { %v474_v44 = vadd.f32 %v1501_v20, %v473_v43 }
  0xef   : > { %v545_v46 = vmax.f32 %v474_v44, 0.0 }
  0xf1   : > { %v577_v47 = vmin.f32 %v545_v46, 6.0 }
  0xf3   : > { %1268 = vmatmul.msk.f32.gmra.mxu1 %vm604_vm2, %v577_v47 }
  0xf4   : > { %v476_v52 = vpop.f32.mrf.mxu0 }
  0xf5   : > { %v477_v53 = vadd.f32 %v1501_v20, %v476_v52 }
  0xf7   : > { %v546_v56 = vmax.f32 %v477_v53, 0.0 }
  0xf9   : > { %v578_v58 = vmin.f32 %v546_v56, 6.0 }
  0xfb   : > { %1269 = vmatmul.msk.f32.gmra.mxu1 %vm604_vm2, %v578_v58 }
  0xfc   : > { %v479_v59 = vpop.f32.mrf.mxu0 }
  0xfd   : > { %v480_v61 = vadd.f32 %v1501_v20, %v479_v59 }
  0xff   : > { %v547_v62 = vmax.f32 %v480_v61, 0.0 }
 0x101   : > { %v579_v0 = vmin.f32 %v547_v62, 6.0 }
 0x103   : > { %1270 = vmatmul.msk.f32.gmra.mxu1 %vm604_vm2, %v579_v0 }
 0x104   : > { %v482_v14 = vpop.f32.mrf.mxu0 }
 0x105   : > { %v483_v16 = vadd.f32 %v1501_v20, %v482_v14 }
 0x107   : > { %v548_v21 = vmax.f32 %v483_v16, 0.0 }
 0x109   : > { %v580_v24 = vmin.f32 %v548_v21, 6.0 }
 0x10b   : > { %1271 = vmatmul.msk.f32.gmra.mxu1 %vm604_vm2, %v580_v24 }
 0x10c   : > { %v485_v25 = vpop.f32.mrf.mxu0 }
 0x10d   : > { %v486_v26 = vadd.f32 %v1501_v20, %v485_v25 }
 0x10f   : > { %v549_v30 = vmax.f32 %v486_v26, 0.0 }
 0x110   : > { %v718_v31 = vpop.f32.mrf.mxu1 }
 0x111   : > { %v581_v33 = vmin.f32 %v549_v30, 6.0  ;;  %v719_v34 = vadd.f32 %v1628_v28, %v718_v31 }
 0x113   : > { %v814_v36 = vmax.f32 %v719_v34, 0.0  ;;  %1272 = vmatmul.msk.f32.gmra.mxu1 %vm604_vm2, %v581_v33 }
 0x114   : > { %v488_v38 = vpop.f32.mrf.mxu0 }
 0x115   : > { %v846_v39 = vmin.f32 %v814_v36, 6.0  ;;  %v489_v40 = vadd.f32 %v1501_v20, %v488_v38 }
 0x117   : > { %v550_v41 = vmax.f32 %v489_v40, 0.0  ;;  %1288 = vmatmul.msk.f32.vlgmr.msra.gmra.mxu2 %vm604_vm2, %v846_v39 }
 0x118   : > { %v721_v43 = vpop.f32.mrf.mxu1 }
 0x119   : > { %v582_v44 = vmin.f32 %v550_v41, 6.0  ;;  %v722_v46 = vadd.f32 %v1628_v28, %v721_v43 }
 0x11b   : > { %v815_v47 = vmax.f32 %v722_v46, 0.0  ;;  %1273 = vmatmul.msk.f32.gmra.mxu1 %vm604_vm2, %v582_v44 }
 0x11c   : > { %v491_v49 = vpop.f32.mrf.mxu0 }
 0x11d   : > { %v847_v50 = vmin.f32 %v815_v47, 6.0  ;;  %v492_v52 = vadd.f32 %v1501_v20, %v491_v49 }
 0x11f   : > { %v551_v53 = vmax.f32 %v492_v52, 0.0  ;;  %1289 = vmatmul.msk.f32.gmra.mxu2 %vm604_vm2, %v847_v50 }
 0x120   : > { %v724_v55 = vpop.f32.mrf.mxu1 }
 0x121   : > { %v583_v56 = vmin.f32 %v551_v53, 6.0  ;;  %v725_v58 = vadd.f32 %v1628_v28, %v724_v55 }
 0x123   : > { %v816_v59 = vmax.f32 %v725_v58, 0.0  ;;  %1274 = vmatmul.msk.f32.gmra.mxu1 %vm604_vm2, %v583_v56 }
 0x124   : > { %v494_v61 = vpop.f32.mrf.mxu0 }
 0x125   : > { %v848_v62 = vmin.f32 %v816_v59, 6.0  ;;  %v495_v0 = vadd.f32 %v1501_v20, %v494_v61  ;;  %v512_v59 = vpop.f32.mrf.mxu3 }
 0x127   : > { %v552_v14 = vmax.f32 %v495_v0, 0.0  ;;  %1290 = vmatmul.msk.f32.gmra.mxu2 %vm604_vm2, %v848_v62 }
 0x128   : > { %v727_v16 = vpop.f32.mrf.mxu1 }
 0x129   : > { %v584_v21 = vmin.f32 %v552_v14, 6.0  ;;  %v728_v24 = vadd.f32 %v1628_v28, %v727_v16 }
 0x12b   : > { %v817_v25 = vmax.f32 %v728_v24, 0.0  ;;  %1275 = vmatmul.msk.f32.gmra.mxu1 %vm604_vm2, %v584_v21 }
 0x12c   : > { %v497_v26 = vpop.f32.mrf.mxu0 }
 0x12d   : > { %v849_v30 = vmin.f32 %v817_v25, 6.0  ;;  %v498_v31 = vadd.f32 %v1501_v20, %v497_v26 }
 0x12f   : > { %v553_v33 = vmax.f32 %v498_v31, 0.0  ;;  %1291 = vmatmul.msk.f32.gmra.mxu2 %vm604_vm2, %v849_v30  ;;  %v515_v31 = vpop.f32.mrf.mxu3 }
 0x130   : > { %v730_v34 = vpop.f32.mrf.mxu1 }
 0x131   : > { %v585_v36 = vmin.f32 %v553_v33, 6.0  ;;  %v731_v38 = vadd.f32 %v1628_v28, %v730_v34 }
 0x133   : > { %v818_v39 = vmax.f32 %v731_v38, 0.0  ;;  %1276 = vmatmul.msk.f32.gmra.mxu1 %vm604_vm2, %v585_v36 }
 0x134   : > { %v500_v40 = vpop.f32.mrf.mxu0 }
 0x135   : > { %v850_v41 = vmin.f32 %v818_v39, 6.0  ;;  %v501_v43 = vadd.f32 %v1501_v20, %v500_v40  ;;  %v513_v40 = vadd.f32 %v1501_v20, %v512_v59 }
 0x137   : > { %v554_v44 = vmax.f32 %v501_v43, 0.0  ;;  %1292 = vmatmul.msk.f32.gmra.mxu2 %vm604_vm2, %v850_v41 }
 0x138   : > { %v733_v46 = vpop.f32.mrf.mxu1 }
 0x139   : > { %v586_v47 = vmin.f32 %v554_v44, 6.0  ;;  %v734_v49 = vadd.f32 %v1628_v28, %v733_v46 }
 0x13b   : > { %v819_v50 = vmax.f32 %v734_v49, 0.0  ;;  %1277 = vmatmul.msk.f32.gmra.mxu1 %vm604_vm2, %v586_v47  ;;  %v558_v47 = vmax.f32 %v513_v40, 0.0  ;;  %v518_v49 = vpop.f32.mrf.mxu3 }
 0x13c   : > { %v503_v52 = vpop.f32.mrf.mxu0 }
 0x13d   : > { %v851_v53 = vmin.f32 %v819_v50, 6.0  ;;  %v504_v55 = vadd.f32 %v1501_v20, %v503_v52  ;;  %v590_v52 = vmin.f32 %v558_v47, 6.0 }
 0x13f   : > { %v555_v56 = vmax.f32 %v504_v55, 0.0  ;;  %1293 = vmatmul.msk.f32.gmra.mxu2 %vm604_vm2, %v851_v53  ;;  %v516_v53 = vadd.f32 %v1501_v20, %v515_v31 }
 0x140   : > { %v736_v58 = vpop.f32.mrf.mxu1 }
 0x141   : > { %v587_v61 = vmin.f32 %v555_v56, 6.0  ;;  %v737_v62 = vadd.f32 %v1628_v28, %v736_v58  ;;  %v559_v59 = vmax.f32 %v516_v53, 0.0 }
 0x143   : > { %v820_v0 = vmax.f32 %v737_v62, 0.0  ;;  %1278 = vmatmul.msk.f32.gmra.mxu1 %vm604_vm2, %v587_v61  ;;  %v521_v62 = vpop.f32.mrf.mxu3 }
 0x144   : > { %v506_v14 = vpop.f32.mrf.mxu0  ;;  %v522_v31 = vadd.f32 %v1501_v20, %v521_v62 }
 0x145   : > { %v852_v16 = vmin.f32 %v820_v0, 6.0  ;;  %v507_v21 = vadd.f32 %v1501_v20, %v506_v14  ;;  %v591_v0 = vmin.f32 %v559_v59, 6.0  ;;  %v519_v14 = vadd.f32 %v1501_v20, %v518_v49 }
 0x147   : > { %v556_v24 = vmax.f32 %v507_v21, 0.0  ;;  %1294 = vmatmul.msk.f32.gmra.mxu2 %vm604_vm2, %v852_v16 }
 0x148   : > { %v739_v25 = vpop.f32.mrf.mxu1 }
 0x149   : > { %v588_v26 = vmin.f32 %v556_v24, 6.0  ;;  %v740_v30 = vadd.f32 %v1628_v28, %v739_v25  ;;  %v560_v25 = vmax.f32 %v519_v14, 0.0 }
 0x14b   : > { %v821_v33 = vmax.f32 %v740_v30, 0.0  ;;  %1279 = vmatmul.msk.f32.gmra.mxu1 %vm604_vm2, %v588_v26  ;;  %v592_v30 = vmin.f32 %v560_v25, 6.0 }
 0x14c   : > { %v509_v34 = vpop.f32.mrf.mxu0 }
 0x14d   : > { %v853_v36 = vmin.f32 %v821_v33, 6.0  ;;  %v510_v38 = vadd.f32 %v1501_v20, %v509_v34  ;;  %v524_v34 = vpop.f32.mrf.mxu3 }
 0x14f   : > { %v557_v39 = vmax.f32 %v510_v38, 0.0  ;;  %1295 = vmatmul.msk.f32.gmra.mxu2 %vm604_vm2, %v853_v36 }
 0x150   : > { %v742_v41 = vpop.f32.mrf.mxu1 }
 0x151   : > { %v589_v43 = vmin.f32 %v557_v39, 6.0  ;;  %v743_v44 = vadd.f32 %v1628_v28, %v742_v41  ;;  %v561_v39 = vmax.f32 %v522_v31, 0.0 }
 0x153   : > { %v822_v46 = vmax.f32 %v743_v44, 0.0  ;;  %1280 = vmatmul.msk.f32.vlgmr.msrb.gmra.mxu3 %vm604_vm2, %v589_v43  ;;  %v593_v41 = vmin.f32 %v561_v39, 6.0  ;;  %v525_v43 = vadd.f32 %v1501_v20, %v524_v34 }
 0x155   : > { %v854_v50 = vmin.f32 %v822_v46, 6.0  ;;  %v527_v47 = vpop.f32.mrf.mxu3 }
 0x157   : > { %1296 = vmatmul.msk.f32.gmra.mxu2 %vm604_vm2, %v854_v50  ;;  %v562_v50 = vmax.f32 %v525_v43, 0.0  ;;  %v1698_v43 = vld [vmem:[%s1874_s6] ss:$0 sm:$0xff] }
 0x158   : > { %v745_v55 = vpop.f32.mrf.mxu1 }
 0x159   : > { %v746_v56 = vadd.f32 %v1628_v28, %v745_v55  ;;  %v594_v53 = vmin.f32 %v562_v50, 6.0  ;;  %v528_v55 = vadd.f32 %v1501_v20, %v527_v47 }
 0x15b   : > { %v823_v58 = vmax.f32 %v746_v56, 0.0  ;;  %1281 = vmatmul.msk.f32.gmra.mxu3 %vm604_vm2, %v590_v52 }
 0x15d   : > { %v855_v61 = vmin.f32 %v823_v58, 6.0  ;;  %v530_v62 = vpop.f32.mrf.mxu3 }
 0x15f   : > { %1297 = vmatmul.msk.f32.gmra.mxu2 %vm604_vm2, %v855_v61  ;;  %v563_v61 = vmax.f32 %v528_v55, 0.0 }
 0x160   : > { %v748_v16 = vpop.f32.mrf.mxu1 }
 0x161   : > { %v749_v21 = vadd.f32 %v1628_v28, %v748_v16  ;;  %v595_v14 = vmin.f32 %v563_v61, 6.0  ;;  %v531_v16 = vadd.f32 %v1501_v20, %v530_v62 }
 0x163   : > { %v824_v24 = vmax.f32 %v749_v21, 0.0  ;;  %1282 = vmatmul.msk.f32.gmra.mxu3 %vm604_vm2, %v591_v0 }
 0x165   : > { %v856_v26 = vmin.f32 %v824_v24, 6.0 }
 0x167   : > { %1298 = vmatmul.msk.f32.gmra.mxu2 %vm604_vm2, %v856_v26  ;;  %v564_v26 = vmax.f32 %v531_v16, 0.0 }
 0x168   : > { %v751_v33 = vpop.f32.mrf.mxu1 }
 0x169   : > { %v752_v36 = vadd.f32 %v1628_v28, %v751_v33  ;;  %v596_v31 = vmin.f32 %v564_v26, 6.0 }
 0x16b   : > { %v825_v38 = vmax.f32 %v752_v36, 0.0  ;;  %1283 = vmatmul.msk.f32.gmra.mxu3 %vm604_vm2, %v592_v30 }
 0x16d   : > { %v857_v40 = vmin.f32 %v825_v38, 6.0 }
 0x16f   : > { %1299 = vmatmul.msk.f32.gmra.mxu2 %vm604_vm2, %v857_v40 }
 0x170   : > { %v754_v44 = vpop.f32.mrf.mxu1 }
 0x171   : > { %v755_v46 = vadd.f32 %v1628_v28, %v754_v44 }
 0x173   : > { %v826_v49 = vmax.f32 %v755_v46, 0.0  ;;  %1284 = vmatmul.msk.f32.gmra.mxu3 %vm604_vm2, %v593_v41 }
 0x175   : > { %v858_v52 = vmin.f32 %v826_v49, 6.0 }
 0x177   : > { %1300 = vmatmul.msk.f32.gmra.mxu2 %vm604_vm2, %v858_v52 }
 0x178   : > { %v757_v56 = vpop.f32.mrf.mxu1 }
 0x179   : > { %v758_v58 = vadd.f32 %v1628_v28, %v757_v56 }
 0x17b   : > { %v827_v59 = vmax.f32 %v758_v58, 0.0  ;;  %1285 = vmatmul.msk.f32.gmra.mxu3 %vm604_vm2, %v594_v53 }
 0x17d   : > { %v859_v0 = vmin.f32 %v827_v59, 6.0 }
 0x17f   : > { %1301 = vmatmul.msk.f32.gmra.mxu2 %vm604_vm2, %v859_v0 }
 0x180   : > { %v760_v21 = vpop.f32.mrf.mxu1 }
 0x181   : > { %v761_v24 = vadd.f32 %v1628_v28, %v760_v21 }
 0x183   : > { %v828_v25 = vmax.f32 %v761_v24, 0.0  ;;  %1286 = vmatmul.msk.f32.gmra.mxu3 %vm604_vm2, %v595_v14 }
 0x185   : > { %v860_v30 = vmin.f32 %v828_v25, 6.0 }
 0x187   : > { %1302 = vmatmul.msk.f32.gmra.mxu2 %vm604_vm2, %v860_v30 }
 0x188   : > { %v763_v33 = vpop.f32.mrf.mxu1 }
 0x189   : > { %v764_v34 = vadd.f32 %v1628_v28, %v763_v33 }
 0x18b   : > { %v829_v36 = vmax.f32 %v764_v34, 0.0  ;;  %1287 = vmatmul.msk.f32.gmra.mxu3 %vm604_vm2, %v596_v31 }
 0x18d   : > { %v861_v38 = vmin.f32 %v829_v36, 6.0 }
 0x18f   : > { %1303 = vmatmul.msk.f32.gmra.mxu2 %vm604_vm2, %v861_v38 }
 0x190   : > { %v766_v20 = vpop.f32.mrf.mxu1 }
 0x191   : > { %v767_v39 = vadd.f32 %v1628_v28, %v766_v20 }
 0x193   : > { %v830_v40 = vmax.f32 %v767_v39, 0.0 }
 0x195   : > { %v862_v41 = vmin.f32 %v830_v40, 6.0 }
 0x197   : > { %1304 = vmatmul.msk.f32.gmra.mxu2 %vm604_vm2, %v862_v41 }
 0x198   : > { %v769_v44 = vpop.f32.mrf.mxu1 }
 0x199   : > { %v770_v46 = vadd.f32 %v1628_v28, %v769_v44 }
 0x19a   : > { %v998_v47 = vpop.f32.mrf.mxu2 }
 0x19b   : > { %v831_v49 = vmax.f32 %v770_v46, 0.0  ;;  %v999_v50 = vadd.f32 %v1698_v43, %v998_v47 }
 0x19d   : > { %v863_v52 = vmin.f32 %v831_v49, 6.0  ;;  %v1094_v53 = vadd.f32 %v999_v50, %v1410_v1 }
 0x19f   : > { %1126 = vst.msk [vmem:[%s1707_s10] sm:$0xff] %vm319_vm1, %v1094_v53  ;;  %1305 = vmatmul.msk.f32.gmra.mxu2 %vm604_vm2, %v863_v52 }
 0x1a0   : > { %v772_v55 = vpop.f32.mrf.mxu1 }
 0x1a1   : > { %v773_v56 = vadd.f32 %v1628_v28, %v772_v55 }
 0x1a2   : > { %v1001_v58 = vpop.f32.mrf.mxu2 }
 0x1a3   : > { %v832_v59 = vmax.f32 %v773_v56, 0.0  ;;  %v1002_v61 = vadd.f32 %v1698_v43, %v1001_v58 }
 0x1a5   : > { %v864_v62 = vmin.f32 %v832_v59, 6.0  ;;  %v1095_v0 = vadd.f32 %v1002_v61, %v1415_v2 }
 0x1a7   : > { %1127 = vst.msk [vmem:[%s1707_s10 + $0x8] sm:$0xff] %vm319_vm1, %v1095_v0  ;;  %1306 = vmatmul.msk.f32.gmra.mxu2 %vm604_vm2, %v864_v62 }
 0x1a8   : > { %v775_v1 = vpop.f32.mrf.mxu1 }
 0x1a9   : > { %v776_v14 = vadd.f32 %v1628_v28, %v775_v1 }
 0x1aa   : > { %v1004_v16 = vpop.f32.mrf.mxu2 }
 0x1ab   : > { %v833_v21 = vmax.f32 %v776_v14, 0.0  ;;  %v1005_v24 = vadd.f32 %v1698_v43, %v1004_v16 }
 0x1ad   : > { %v865_v25 = vmin.f32 %v833_v21, 6.0  ;;  %v1096_v26 = vadd.f32 %v1005_v24, %v1420_v3 }
 0x1af   : > { %1128 = vst.msk [vmem:[%s1707_s10 + $0x10] sm:$0xff] %vm319_vm1, %v1096_v26  ;;  %1307 = vmatmul.msk.f32.gmra.mxu2 %vm604_vm2, %v865_v25 }
 0x1b0   : > { %v778_v2 = vpop.f32.mrf.mxu1 }
 0x1b1   : > { %v779_v30 = vadd.f32 %v1628_v28, %v778_v2 }
 0x1b2   : > { %v1007_v31 = vpop.f32.mrf.mxu2 }
 0x1b3   : > { %v834_v33 = vmax.f32 %v779_v30, 0.0  ;;  %v1008_v34 = vadd.f32 %v1698_v43, %v1007_v31 }
 0x1b5   : > { %v866_v36 = vmin.f32 %v834_v33, 6.0  ;;  %v1097_v38 = vadd.f32 %v1008_v34, %v1425_v4 }
 0x1b7   : > { %1129 = vst.msk [vmem:[%s1707_s10 + $0x18] sm:$0xff] %vm319_vm1, %v1097_v38  ;;  %1308 = vmatmul.msk.f32.gmra.mxu2 %vm604_vm2, %v866_v36 }
 0x1b8   : > { %v781_v3 = vpop.f32.mrf.mxu1 }
 0x1b9   : > { %v782_v20 = vadd.f32 %v1628_v28, %v781_v3 }
 0x1ba   : > { %v1010_v39 = vpop.f32.mrf.mxu2 }
 0x1bb   : > { %v835_v40 = vmax.f32 %v782_v20, 0.0  ;;  %v1011_v41 = vadd.f32 %v1698_v43, %v1010_v39 }
 0x1bd   : > { %v867_v44 = vmin.f32 %v835_v40, 6.0  ;;  %v1098_v46 = vadd.f32 %v1011_v41, %v1430_v5 }
 0x1bf   : > { %1130 = vst.msk [vmem:[%s1707_s10 + $0x20] sm:$0xff] %vm319_vm1, %v1098_v46  ;;  %1309 = vmatmul.msk.f32.gmra.mxu2 %vm604_vm2, %v867_v44 }
 0x1c0   : > { %v784_v4 = vpop.f32.mrf.mxu1 }
 0x1c1   : > { %v785_v47 = vadd.f32 %v1628_v28, %v784_v4 }
 0x1c2   : > { %v1013_v49 = vpop.f32.mrf.mxu2 }
 0x1c3   : > { %v836_v50 = vmax.f32 %v785_v47, 0.0  ;;  %v1014_v52 = vadd.f32 %v1698_v43, %v1013_v49 }
 0x1c5   : > { %v868_v53 = vmin.f32 %v836_v50, 6.0  ;;  %v1099_v55 = vadd.f32 %v1014_v52, %v1435_v6 }
 0x1c7   : > { %1131 = vst.msk [vmem:[%s1707_s10 + $0x28] sm:$0xff] %vm319_vm1, %v1099_v55  ;;  %1310 = vmatmul.msk.f32.gmra.mxu2 %vm604_vm2, %v868_v53 }
 0x1c8   : > { %v787_v5 = vpop.f32.mrf.mxu1 }
 0x1c9   : > { %v788_v56 = vadd.f32 %v1628_v28, %v787_v5 }
 0x1ca   : > { %v1016_v58 = vpop.f32.mrf.mxu2 }
 0x1cb   : > { %v837_v59 = vmax.f32 %v788_v56, 0.0  ;;  %v1017_v61 = vadd.f32 %v1698_v43, %v1016_v58 }
 0x1cd   : > { %v869_v62 = vmin.f32 %v837_v59, 6.0  ;;  %v1100_v0 = vadd.f32 %v1017_v61, %v1440_v7 }
 0x1cf   : > { %1132 = vst.msk [vmem:[%s1707_s10 + $0x30] sm:$0xff] %vm319_vm1, %v1100_v0  ;;  %1311 = vmatmul.msk.f32.gmra.mxu2 %vm604_vm2, %v869_v62 }
 0x1d2   : > { %v1019_v6 = vpop.f32.mrf.mxu2 }
 0x1d3   : > { %v1020_v1 = vadd.f32 %v1698_v43, %v1019_v6 }
 0x1d5   : > { %v1101_v14 = vadd.f32 %v1020_v1, %v1445_v8 }
 0x1d6   : > { %v790_v16 = vpop.f32.mrf.mxu3 }
 0x1d7   : > { %1133 = vst.msk [vmem:[%s1707_s10 + $0x38] sm:$0xff] %vm319_vm1, %v1101_v14  ;;  %v791_v21 = vadd.f32 %v1628_v28, %v790_v16 }
 0x1d9   : > { %v838_v24 = vmax.f32 %v791_v21, 0.0 }
 0x1da   : > { %v1022_v25 = vpop.f32.mrf.mxu2 }
 0x1db   : > { %v870_v26 = vmin.f32 %v838_v24, 6.0  ;;  %v1023_v7 = vadd.f32 %v1698_v43, %v1022_v25 }
 0x1dd   : > { %v1102_v2 = vadd.f32 %v1023_v7, %v1450_v9  ;;  %1312 = vmatmul.msk.f32.vlgmr.msra.gmra.mxu3 %vm604_vm2, %v870_v26 }
 0x1de   : > { %v793_v30 = vpop.f32.mrf.mxu3 }
 0x1df   : > { %1134 = vst.msk [vmem:[%s1707_s10 + $0x40] sm:$0xff] %vm319_vm1, %v1102_v2  ;;  %v794_v8 = vadd.f32 %v1628_v28, %v793_v30 }
 0x1e1   : > { %v839_v31 = vmax.f32 %v794_v8, 0.0 }
 0x1e2   : > { %v1025_v33 = vpop.f32.mrf.mxu2 }
 0x1e3   : > { %v871_v34 = vmin.f32 %v839_v31, 6.0  ;;  %v1026_v36 = vadd.f32 %v1698_v43, %v1025_v33 }
 0x1e5   : > { %v1103_v38 = vadd.f32 %v1026_v36, %v1455_v10  ;;  %1313 = vmatmul.msk.f32.gmra.mxu3 %vm604_vm2, %v871_v34 }
 0x1e6   : > { %v796_v3 = vpop.f32.mrf.mxu3 }
 0x1e7   : > { %1135 = vst.msk [vmem:[%s1707_s10 + $0x48] sm:$0xff] %vm319_vm1, %v1103_v38  ;;  %v797_v9 = vadd.f32 %v1628_v28, %v796_v3 }
 0x1e9   : > { %v840_v20 = vmax.f32 %v797_v9, 0.0 }
 0x1ea   : > { %v1028_v39 = vpop.f32.mrf.mxu2 }
 0x1eb   : > { %v872_v40 = vmin.f32 %v840_v20, 6.0  ;;  %v1029_v41 = vadd.f32 %v1698_v43, %v1028_v39 }
 0x1ed   : > { %v1104_v44 = vadd.f32 %v1029_v41, %v1460_v11  ;;  %1314 = vmatmul.msk.f32.gmra.mxu3 %vm604_vm2, %v872_v40 }
 0x1ee   : > { %v799_v46 = vpop.f32.mrf.mxu3 }
 0x1ef   : > { %1136 = vst.msk [vmem:[%s1707_s10 + $0x50] sm:$0xff] %vm319_vm1, %v1104_v44  ;;  %v800_v10 = vadd.f32 %v1628_v28, %v799_v46 }
 0x1f1   : > { %v841_v4 = vmax.f32 %v800_v10, 0.0 }
 0x1f2   : > { %v1031_v47 = vpop.f32.mrf.mxu2 }
 0x1f3   : > { %v873_v49 = vmin.f32 %v841_v4, 6.0  ;;  %v1032_v50 = vadd.f32 %v1698_v43, %v1031_v47 }
 0x1f5   : > { %v1105_v52 = vadd.f32 %v1032_v50, %v1465_v12  ;;  %1315 = vmatmul.msk.f32.gmra.mxu3 %vm604_vm2, %v873_v49 }
 0x1f6   : > { %v802_v53 = vpop.f32.mrf.mxu3 }
 0x1f7   : > { %1137 = vst.msk [vmem:[%s1707_s10 + $0x58] sm:$0xff] %vm319_vm1, %v1105_v52  ;;  %v803_v11 = vadd.f32 %v1628_v28, %v802_v53 }
 0x1f9   : > { %v842_v55 = vmax.f32 %v803_v11, 0.0 }
 0x1fa   : > { %v1034_v5 = vpop.f32.mrf.mxu2 }
 0x1fb   : > { %v874_v56 = vmin.f32 %v842_v55, 6.0  ;;  %v1035_v58 = vadd.f32 %v1698_v43, %v1034_v5 }
 0x1fd   : > { %v1106_v59 = vadd.f32 %v1035_v58, %v1470_v13  ;;  %1316 = vmatmul.msk.f32.gmra.mxu3 %vm604_vm2, %v874_v56 }
 0x1fe   : > { %v805_v61 = vpop.f32.mrf.mxu3 }
 0x1ff   : > { %1138 = vst.msk [vmem:[%s1707_s10 + $0x60] sm:$0xff] %vm319_vm1, %v1106_v59  ;;  %v806_v12 = vadd.f32 %v1628_v28, %v805_v61 }
 0x201   : > { %v843_v62 = vmax.f32 %v806_v12, 0.0 }
 0x202   : > { %v1037_v0 = vpop.f32.mrf.mxu2 }
 0x203   : > { %v875_v6 = vmin.f32 %v843_v62, 6.0  ;;  %v1038_v1 = vadd.f32 %v1698_v43, %v1037_v0 }
 0x205   : > { %v1107_v14 = vadd.f32 %v1038_v1, %v1484_v17  ;;  %1317 = vmatmul.msk.f32.gmra.mxu3 %vm604_vm2, %v875_v6 }
 0x206   : > { %v808_v16 = vpop.f32.mrf.mxu3 }
 0x207   : > { %1139 = vst.msk [vmem:[%s1707_s10 + $0x68] sm:$0xff] %vm319_vm1, %v1107_v14  ;;  %v809_v13 = vadd.f32 %v1628_v28, %v808_v16 }
 0x209   : > { %v844_v21 = vmax.f32 %v809_v13, 0.0 }
 0x20a   : > { %v1040_v24 = vpop.f32.mrf.mxu2 }
 0x20b   : > { %v876_v25 = vmin.f32 %v844_v21, 6.0  ;;  %v1041_v26 = vadd.f32 %v1698_v43, %v1040_v24 }
 0x20d   : > { %v1108_v7 = vadd.f32 %v1041_v26, %v1489_v18  ;;  %1318 = vmatmul.msk.f32.gmra.mxu3 %vm604_vm2, %v876_v25 }
 0x20e   : > { %v811_v2 = vpop.f32.mrf.mxu3 }
 0x20f   : > { %1140 = vst.msk [vmem:[%s1707_s10 + $0x70] sm:$0xff] %vm319_vm1, %v1108_v7  ;;  %v812_v17 = vadd.f32 %v1628_v28, %v811_v2 }
 0x211   : > { %v845_v30 = vmax.f32 %v812_v17, 0.0 }
 0x212   : > { %v1043_v8 = vpop.f32.mrf.mxu2 }
 0x213   : > { %v877_v31 = vmin.f32 %v845_v30, 6.0  ;;  %v1044_v33 = vadd.f32 %v1698_v43, %v1043_v8 }
 0x215   : > { %v1109_v34 = vadd.f32 %v1044_v33, %v1494_v19  ;;  %1319 = vmatmul.msk.f32.gmra.mxu3 %vm604_vm2, %v877_v31 }
 0x217   : > { %1141 = vst.msk [vmem:[%s1707_s10 + $0x78] sm:$0xff] %vm319_vm1, %v1109_v34 }
 0x21a   : > { %v1046_v18 = vpop.f32.mrf.mxu2 }
 0x21b   : > { %v1047_v36 = vadd.f32 %v1698_v43, %v1046_v18 }
 0x21d   : > { %v1110_v38 = vadd.f32 %v1047_v36, %v1504_v22 }
 0x21f   : > { %1142 = vst.msk [vmem:[%s1707_s10 + $0x80] sm:$0xff] %vm319_vm1, %v1110_v38 }
 0x222   : > { %v1049_v28 = vpop.f32.mrf.mxu2 }
 0x223   : > { %v1050_v3 = vadd.f32 %v1698_v43, %v1049_v28 }
 0x225   : > { %v1111_v9 = vadd.f32 %v1050_v3, %v1511_v27 }
 0x227   : > { %1143 = vst.msk [vmem:[%s1707_s10 + $0x88] sm:$0xff] %vm319_vm1, %v1111_v9 }
 0x22a   : > { %v1052_v19 = vpop.f32.mrf.mxu2 }
 0x22b   : > { %v1053_v20 = vadd.f32 %v1698_v43, %v1052_v19 }
 0x22d   : > { %v1112_v39 = vadd.f32 %v1053_v20, %v1518_v32 }
 0x22f   : > { %1144 = vst.msk [vmem:[%s1707_s10 + $0x90] sm:$0xff] %vm319_vm1, %v1112_v39 }
 0x232   : > { %v1055_v22 = vpop.f32.mrf.mxu2 }
 0x233   : > { %v1056_v40 = vadd.f32 %v1698_v43, %v1055_v22 }
 0x235   : > { %v1113_v41 = vadd.f32 %v1056_v40, %v1525_v37 }
 0x237   : > { %1145 = vst.msk [vmem:[%s1707_s10 + $0x98] sm:$0xff] %vm319_vm1, %v1113_v41 }
 0x23a   : > { %v1058_v27 = vpop.f32.mrf.mxu2 }
 0x23b   : > { %v1059_v44 = vadd.f32 %v1698_v43, %v1058_v27 }
 0x23d   : > { %v1114_v46 = vadd.f32 %v1059_v44, %v1532_v42 }
 0x23f   : > { %1146 = vst.msk [vmem:[%s1707_s10 + $0xa0] sm:$0xff] %vm319_vm1, %v1114_v46 }
 0x242   : > { %v1061_v32 = vpop.f32.mrf.mxu2 }
 0x243   : > { %v1062_v10 = vadd.f32 %v1698_v43, %v1061_v32 }
 0x245   : > { %v1115_v4 = vadd.f32 %v1062_v10, %v1544_v48 }
 0x247   : > { %1147 = vst.msk [vmem:[%s1707_s10 + $0xa8] sm:$0xff] %vm319_vm1, %v1115_v4 }
 0x24a   : > { %v1064_v37 = vpop.f32.mrf.mxu2 }
 0x24b   : > { %v1065_v47 = vadd.f32 %v1698_v43, %v1064_v37 }
 0x24d   : > { %v1116_v49 = vadd.f32 %v1065_v47, %v1556_v54 }
 0x24f   : > { %1148 = vst.msk [vmem:[%s1707_s10 + $0xb0] sm:$0xff] %vm319_vm1, %v1116_v49 }
 0x252   : > { %v1067_v42 = vpop.f32.mrf.mxu2 }
 0x253   : > { %v1068_v50 = vadd.f32 %v1698_v43, %v1067_v42 }
 0x255   : > { %v1117_v52 = vadd.f32 %v1068_v50, %v1568_v60 }
 0x257   : > { %1149 = vst.msk [vmem:[%s1707_s10 + $0xb8] sm:$0xff] %vm319_vm1, %v1117_v52 }
 0x260   : > { %v1070_v48 = vpop.f32.mrf.mxu3 }
 0x261   : > { %v1071_v53 = vadd.f32 %v1698_v43, %v1070_v48 }
 0x263   : > { %v1118_v11 = vadd.f32 %v1071_v53, %v1580_v15 }
 0x265   : > { %1150 = vst.msk [vmem:[%s1707_s10 + $0xc0] sm:$0xff] %vm319_vm1, %v1118_v11 }
 0x268   : > { %v1073_v54 = vpop.f32.mrf.mxu3 }
 0x269   : > { %v1074_v55 = vadd.f32 %v1698_v43, %v1073_v54 }
 0x26b   : > { %v1119_v5 = vadd.f32 %v1074_v55, %v1538_v45 }
 0x26d   : > { %1151 = vst.msk [vmem:[%s1707_s10 + $0xc8] sm:$0xff] %vm319_vm1, %v1119_v5 }
 0x270   : > { %v1076_v60 = vpop.f32.mrf.mxu3 }
 0x271   : > { %v1077_v56 = vadd.f32 %v1698_v43, %v1076_v60 }
 0x273   : > { %v1120_v58 = vadd.f32 %v1077_v56, %v1550_v51 }
 0x275   : > { %1152 = vst.msk [vmem:[%s1707_s10 + $0xd0] sm:$0xff] %vm319_vm1, %v1120_v58 }
 0x278   : > { %v1079_v15 = vpop.f32.mrf.mxu3 }
 0x279   : > { %v1080_v59 = vadd.f32 %v1698_v43, %v1079_v15 }
 0x27b   : > { %v1121_v61 = vadd.f32 %v1080_v59, %v1562_v57 }
 0x27d   : > { %1153 = vst.msk [vmem:[%s1707_s10 + $0xd8] sm:$0xff] %vm319_vm1, %v1121_v61 }
 0x280   : > { %v1082_v45 = vpop.f32.mrf.mxu3 }
 0x281   : > { %v1083_v12 = vadd.f32 %v1698_v43, %v1082_v45 }
 0x283   : > { %v1122_v62 = vadd.f32 %v1083_v12, %v1574_v63 }
 0x285   : > { %1154 = vst.msk [vmem:[%s1707_s10 + $0xe0] sm:$0xff] %vm319_vm1, %v1122_v62 }
 0x288   : > { %v1085_v0 = vpop.f32.mrf.mxu3 }
 0x289   : > { %v1086_v51 = vadd.f32 %v1698_v43, %v1085_v0 }
 0x28b   : > { %v1123_v6 = vadd.f32 %v1086_v51, %v1586_v23 }
 0x28d   : > { %1155 = vst.msk [vmem:[%s1707_s10 + $0xe8] sm:$0xff] %vm319_vm1, %v1123_v6 }
 0x290   : > { %v1088_v1 = vpop.f32.mrf.mxu3 }
 0x291   : > { %v1089_v57 = vadd.f32 %v1698_v43, %v1088_v1 }
 0x293   : > { %v1124_v14 = vadd.f32 %v1089_v57, %v1593_v29 }
 0x295   : > { %1156 = vst.msk [vmem:[%s1707_s10 + $0xf0] sm:$0xff] %vm319_vm1, %v1124_v14 }
 0x298   : > { %v1091_v16 = vpop.f32.mrf.mxu3 }
 0x299   : > { %v1092_v13 = vadd.f32 %v1698_v43, %v1091_v16 }
 0x29b   : > { %v1125_v63 = vadd.f32 %v1092_v13, %v1600_v35 }
 0x29d   : > { %1157 = vst.msk [vmem:[%s1707_s10 + $0xf8] sm:$0xff] %vm319_vm1, %v1125_v63 }
 0x29e PF: > { %s17_s24 = sadd.s32 1, %s1346_s24  }
 0x29f   : > { %p14_p4 = scmp.ge.s32.totalorder %s17_s24, 4  }
 0x2a1   :  { %16 = sbr.rel (!%p14_p4) target bundleno = 1 (0x1), region = 78 }

</bundles_post_ra>
